<compile_context>
chip_gen: v5e
topology: v5e:2x2
jax: 0.10.0
libtpu: 0.0.40
codegen_flags: <defaults>
</compile_context>

<pallas_src>
import inspect

import jax
import jax.numpy as jnp
from jax.experimental import pallas as pl
from jax.experimental.pallas import tpu as pltpu


def _round_up(x, m):
    return (x + m - 1) // m * m


try:
    _HAS_PIPELINE_MODE = (
        "pipeline_mode" in inspect.signature(pl.BlockSpec).parameters
        and hasattr(pl, "Buffered")
    )
except (TypeError, ValueError):  # pragma: no cover
    _HAS_PIPELINE_MODE = False


def _discriminator_kernel(x_ref, w1_ref, b1_ref, w2_ref, b2_ref, o_ref):
    # x_ref : [TILE_N, Fin] (input dtype, e.g. f32)
    # w1_ref: [Fin, H_p]    (bf16)
    # b1_ref: [1, H_p] f32   w2_ref: [1, H_p] f32   b2_ref: [1, 1] f32
    # o_ref : [TILE_N, 1] f32

    # In-kernel bf16 cast (VPU, hidden under the x DMA) -> fc1 on the MXU with
    # f32 accumulation; bias + ReLU on the VPU in f32.
    x_c = x_ref[...].astype(w1_ref.dtype)
    h = jnp.dot(x_c, w1_ref[...], preferred_element_type=jnp.float32)
    h = jnp.maximum(h + b1_ref[...], 0.0)

    # fc2 (H -> 1): VPU multiply + lane (XLU) reduction.
    out = jnp.sum(h * w2_ref[...], axis=-1, keepdims=True) + b2_ref[...]
    o_ref[...] = out.astype(o_ref.dtype)


def _build_call(n, fin, h_p, tile_n, grid_n, use_single_buffer_weights,
                vmem_limit, cost):
    def const_spec(shape):
        # Invariant blocks: same block index every step -> single buffer is
        # enough; halves their VMEM footprint (matters on v7x).
        if use_single_buffer_weights:
            return pl.BlockSpec(shape, lambda i: (0, 0),
                                pipeline_mode=pl.Buffered(1))
        return pl.BlockSpec(shape, lambda i: (0, 0))

    return pl.pallas_call(
        _discriminator_kernel,
        out_shape=jax.ShapeDtypeStruct((n, 1), jnp.float32),
        grid_spec=pltpu.PrefetchScalarGridSpec(
            num_scalar_prefetch=0,
            grid=(grid_n,),
            in_specs=[
                pl.BlockSpec((tile_n, fin), lambda i: (i, 0)),  # x: streamed
                const_spec((fin, h_p)),                         # w1 (bf16)
                const_spec((1, h_p)),                           # b1
                const_spec((1, h_p)),                           # w2 row
                const_spec((1, 1)),                             # b2
            ],
            out_specs=pl.BlockSpec((tile_n, 1), lambda i: (i, 0)),
        ),
        compiler_params=pltpu.CompilerParams(
            # N tiles are independent -> shard across v7x's 2 TensorCores.
            dimension_semantics=("parallel",),
            vmem_limit_bytes=vmem_limit,
        ),
        cost_estimate=cost,
    )


def discriminator_forward(x, w1, b1, w2, b2, *, compute_dtype=jnp.bfloat16,
                          tile_n_max=8192):
    """x: [N, Fin]; w1: [Fin, H]; b1: [H]; w2: [H, 1]; b2: [1] -> [N, 1]."""
    n, fin = x.shape
    h_dim = w1.shape[1]
    out_dtype = x.dtype

    # --- pad only the tiny hidden dim of the weights to a lane multiple -----
    # (Fin is left at natural size; x itself is never padded or re-cast.)
    h_p = _round_up(h_dim, 128)
    if h_p != h_dim:
        w1 = jnp.pad(w1, ((0, 0), (0, h_p - h_dim)))
        b1 = jnp.pad(b1, (0, h_p - h_dim))
        w2 = jnp.pad(w2, ((0, h_p - h_dim), (0, 0)))

    w1_c = w1.astype(compute_dtype)               # weights are tiny: cast here
    b1_row = b1.reshape(1, h_p).astype(jnp.float32)
    w2_row = w2.reshape(1, h_p).astype(jnp.float32)
    b2_2d = b2.reshape(1, 1).astype(jnp.float32)

    # --- batch tiling --------------------------------------------------------
    x_bytes = jnp.dtype(x.dtype).itemsize
    cdt_bytes = jnp.dtype(compute_dtype).itemsize
    per_buf_budget = 2 * 1024 * 1024              # ~2 MiB of x per pipeline buffer
    rows_from_vmem = max(8, (per_buf_budget // max(1, fin * x_bytes)) // 8 * 8)
    if n <= 8:
        tile_n = n                                # one block; full-dim block is legal
    else:
        # Keep >= 2 tiles so both v7x TensorCores get work (neutral elsewhere).
        half = _round_up(-(-n // 2), 8)
        tile_n = max(8, min(tile_n_max, rows_from_vmem, half))
    grid_n = pl.cdiv(n, tile_n)                   # last block may be partial;
                                                  # Pallas masks OOB reads/writes and
                                                  # rows are independent -> no x pad.

    vmem_need = (
        2 * tile_n * fin * x_bytes                # double-buffered x tiles
        + 2 * fin * h_p * cdt_bytes               # w1 (worst case 2 buffers)
        + 2 * 2 * h_p * 4                         # b1 + w2 rows
        + 2 * tile_n * 4                          # double-buffered out tiles
        + 2 * 4
    )
    vmem_limit = int(max(vmem_need * 2, 16 * 1024 * 1024))

    cost = pl.CostEstimate(
        flops=2 * n * fin * h_dim + 2 * n * h_dim,
        transcendentals=0,
        bytes_accessed=int(n * fin * x_bytes + fin * h_p * cdt_bytes
                           + 2 * h_p * 4 + 4 + n * 4),
    )

    args = (x, w1_c, b1_row, w2_row, b2_2d)
    if _HAS_PIPELINE_MODE:
        try:
            out = _build_call(n, fin, h_p, tile_n, grid_n, True,
                              vmem_limit, cost)(*args)
        except Exception:
            # Fall back if single-buffered pipeline_mode is rejected by this
            # jax/Mosaic version; semantics identical, only VMEM use differs.
            out = _build_call(n, fin, h_p, tile_n, grid_n, False,
                              vmem_limit, cost)(*args)
    else:
        out = _build_call(n, fin, h_p, tile_n, grid_n, False,
                          vmem_limit, cost)(*args)

    return out.astype(out_dtype)


def init_params(key, in_features, hidden_dim):
    """torch.nn.Linear-style init: U[-1/sqrt(fan_in), 1/sqrt(fan_in)]."""
    k1, k2, k3, k4 = jax.random.split(key, 4)
    bound1 = 1.0 / jnp.sqrt(in_features)
    bound2 = 1.0 / jnp.sqrt(hidden_dim)
    # Stored as [in, out] (transposed relative to torch's [out, in]).
    w1 = jax.random.uniform(k1, (in_features, hidden_dim), jnp.float32, -bound1, bound1)
    b1 = jax.random.uniform(k2, (hidden_dim,), jnp.float32, -bound1, bound1)
    w2 = jax.random.uniform(k3, (hidden_dim, 1), jnp.float32, -bound2, bound2)
    b2 = jax.random.uniform(k4, (1,), jnp.float32, -bound2, bound2)
    return w1, b1, w2, b2


if __name__ == "__main__":
    in_features = 64
    hidden_dim = 32
    batch = 8

    key = jax.random.PRNGKey(0)
    kx, kx2, kp = jax.random.split(key, 3)
    x = jax.random.normal(kx, (batch, in_features), jnp.float32)
    w1, b1, w2, b2 = init_params(kp, in_features, hidden_dim)

    out = discriminator_forward(x, w1, b1, w2, b2)
    out = jax.block_until_ready(out)
    assert out.shape == (batch, 1)

    # Full-precision reference (torch semantics) with bf16-appropriate tolerance.
    ref = jnp.maximum(x @ w1 + b1, 0.0) @ w2 + b2
    assert jnp.allclose(out, ref, atol=5e-2, rtol=5e-2)

    # Second shape exercising the multi-tile path with a partial last block
    # (N=13 -> tile_n=8, grid=2) -- no batch padding is ever materialized.
    x2 = jax.random.normal(kx2, (13, in_features), jnp.float32)
    out2 = jax.block_until_ready(discriminator_forward(x2, w1, b1, w2, b2))
    ref2 = jnp.maximum(x2 @ w1 + b1, 0.0) @ w2 + b2
    assert out2.shape == (13, 1)
    assert jnp.allclose(out2, ref2, atol=5e-2, rtol=5e-2)

    print("KERNEL_OK")
</pallas_src>

<mosaic_0001>
module attributes {stable_mosaic.version = 11 : i64} {
  func.func @_discriminator_kernel(%arg0: i32, %arg1: memref<8x64xf32, #tpu.memory_space<vmem>>, %arg2: memref<64x128xbf16, #tpu.memory_space<vmem>>, %arg3: memref<1x128xf32, #tpu.memory_space<vmem>>, %arg4: memref<1x128xf32, #tpu.memory_space<vmem>>, %arg5: memref<1x1xf32, #tpu.memory_space<vmem>>, %arg6: memref<8x1xf32, #tpu.memory_space<vmem>>) attributes {dimension_semantics = [#tpu.dimension_semantics<parallel>], iteration_bounds = array<i64: 1>, scalar_prefetch = 0 : i64, scratch_operands = 0 : i64, tpu.core_type = #tpu.core_type<tc>, window_params = [{transform_indices = @transform_0, window_bounds = array<i64: 8, 64>}, {pipeline_mode = #tpu.pipeline_mode<synchronous>, transform_indices = @transform_1, window_bounds = array<i64: 64, 128>}, {pipeline_mode = #tpu.pipeline_mode<synchronous>, transform_indices = @transform_2, window_bounds = array<i64: 1, 128>}, {pipeline_mode = #tpu.pipeline_mode<synchronous>, transform_indices = @transform_3, window_bounds = array<i64: 1, 128>}, {pipeline_mode = #tpu.pipeline_mode<synchronous>, transform_indices = @transform_4, window_bounds = array<i64: 1, 1>}, {transform_indices = @transform_5, window_bounds = array<i64: 8, 1>}]} {
    %c0 = arith.constant 0 : index
    %c0_0 = arith.constant 0 : index
    %0 = vector.load %arg1[%c0, %c0_0] : memref<8x64xf32, #tpu.memory_space<vmem>>, vector<8x64xf32>
    %1 = arith.truncf %0 : vector<8x64xf32> to vector<8x64xbf16>
    %c0_1 = arith.constant 0 : index
    %c0_2 = arith.constant 0 : index
    %2 = vector.load %arg2[%c0_1, %c0_2] : memref<64x128xbf16, #tpu.memory_space<vmem>>, vector<64x128xbf16>
    %cst = arith.constant dense<0.000000e+00> : vector<8x128xf32>
    %3 = tpu.matmul %1, %2, %cst {dimension_numbers = #tpu.dot_dimension_numbers<[1], [0], [0], [1], [0, 0, 1, 1], [], []>} : vector<8x64xbf16>, vector<64x128xbf16>, vector<8x128xf32> -> vector<8x128xf32>
    %c0_3 = arith.constant 0 : index
    %c0_4 = arith.constant 0 : index
    %4 = vector.load %arg3[%c0_3, %c0_4] : memref<1x128xf32, #tpu.memory_space<vmem>>, vector<1x128xf32>
    %5 = vector.broadcast %4 : vector<1x128xf32> to vector<8x128xf32>
    %6 = arith.addf %3, %5 : vector<8x128xf32>
    %cst_5 = arith.constant 0.000000e+00 : f32
    %7 = vector.broadcast %cst_5 : f32 to vector<8x128xf32>
    %8 = arith.maximumf %6, %7 : vector<8x128xf32>
    %c0_6 = arith.constant 0 : index
    %c0_7 = arith.constant 0 : index
    %9 = vector.load %arg4[%c0_6, %c0_7] : memref<1x128xf32, #tpu.memory_space<vmem>>, vector<1x128xf32>
    %10 = vector.broadcast %9 : vector<1x128xf32> to vector<8x128xf32>
    %11 = arith.mulf %8, %10 : vector<8x128xf32>
    %cst_8 = arith.constant dense<0.000000e+00> : vector<8xf32>
    %12 = vector.multi_reduction <add>, %11, %cst_8 [1] : vector<8x128xf32> to vector<8xf32>
    %13 = vector.shape_cast %12 : vector<8xf32> to vector<8x1xf32>
    %c0_9 = arith.constant 0 : index
    %c0_10 = arith.constant 0 : index
    %14 = vector.load %arg5[%c0_9, %c0_10] : memref<1x1xf32, #tpu.memory_space<vmem>>, vector<1x1xf32>
    %15 = vector.broadcast %14 : vector<1x1xf32> to vector<8x1xf32>
    %16 = arith.addf %13, %15 : vector<8x1xf32>
    %c0_11 = arith.constant 0 : index
    %c0_12 = arith.constant 0 : index
    %17 = vector.load %arg6[%c0_11, %c0_12] : memref<8x1xf32, #tpu.memory_space<vmem>>, vector<8x1xf32>
    tpu.vector_store %arg6[%c0_11, %c0_12], %16 {strides = array<i32>} : memref<8x1xf32, #tpu.memory_space<vmem>>, vector<8x1xf32>,
    return
  }
  func.func @transform_0(%arg0: i32) -> (i32, i32) {
    %c0_i32 = arith.constant 0 : i32
    %c0_i32_0 = arith.constant 0 : i32
    return %arg0, %c0_i32 : i32, i32
  }
  func.func @transform_1(%arg0: i32) -> (i32, i32) {
    %c0_i32 = arith.constant 0 : i32
    %c0_i32_0 = arith.constant 0 : i32
    %c0_i32_1 = arith.constant 0 : i32
    return %c0_i32, %c0_i32_0 : i32, i32
  }
  func.func @transform_2(%arg0: i32) -> (i32, i32) {
    %c0_i32 = arith.constant 0 : i32
    %c0_i32_0 = arith.constant 0 : i32
    %c0_i32_1 = arith.constant 0 : i32
    return %c0_i32, %c0_i32_0 : i32, i32
  }
  func.func @transform_3(%arg0: i32) -> (i32, i32) {
    %c0_i32 = arith.constant 0 : i32
    %c0_i32_0 = arith.constant 0 : i32
    %c0_i32_1 = arith.constant 0 : i32
    return %c0_i32, %c0_i32_0 : i32, i32
  }
  func.func @transform_4(%arg0: i32) -> (i32, i32) {
    %c0_i32 = arith.constant 0 : i32
    %c0_i32_0 = arith.constant 0 : i32
    %c0_i32_1 = arith.constant 0 : i32
    return %c0_i32, %c0_i32_0 : i32, i32
  }
  func.func @transform_5(%arg0: i32) -> (i32, i32) {
    %c0_i32 = arith.constant 0 : i32
    %c0_i32_0 = arith.constant 0 : i32
    return %arg0, %c0_i32 : i32, i32
  }
}

module attributes {stable_mosaic.version = 11 : i64} {
  func.func @_discriminator_kernel(%arg0: i32, %arg1: memref<8x64xf32, #tpu.memory_space<vmem>>, %arg2: memref<64x128xbf16, #tpu.memory_space<vmem>>, %arg3: memref<1x128xf32, #tpu.memory_space<vmem>>, %arg4: memref<1x128xf32, #tpu.memory_space<vmem>>, %arg5: memref<1x1xf32, #tpu.memory_space<vmem>>, %arg6: memref<8x1xf32, #tpu.memory_space<vmem>>) attributes {dimension_semantics = [#tpu.dimension_semantics<parallel>], iteration_bounds = array<i64: 1>, scalar_prefetch = 0 : i64, scratch_operands = 0 : i64, tpu.core_type = #tpu.core_type<tc>, window_params = [{transform_indices = @transform_0, window_bounds = array<i64: 8, 64>}, {pipeline_mode = #tpu.pipeline_mode<synchronous>, transform_indices = @transform_1, window_bounds = array<i64: 64, 128>}, {pipeline_mode = #tpu.pipeline_mode<synchronous>, transform_indices = @transform_2, window_bounds = array<i64: 1, 128>}, {pipeline_mode = #tpu.pipeline_mode<synchronous>, transform_indices = @transform_3, window_bounds = array<i64: 1, 128>}, {pipeline_mode = #tpu.pipeline_mode<synchronous>, transform_indices = @transform_4, window_bounds = array<i64: 1, 1>}, {transform_indices = @transform_5, window_bounds = array<i64: 8, 1>}]} {
    %c0 = arith.constant 0 : index
    %c0_0 = arith.constant 0 : index
    %0 = vector.load %arg1[%c0, %c0_0] : memref<8x64xf32, #tpu.memory_space<vmem>>, vector<8x64xf32>
    %1 = arith.truncf %0 : vector<8x64xf32> to vector<8x64xbf16>
    %c0_1 = arith.constant 0 : index
    %c0_2 = arith.constant 0 : index
    %2 = vector.load %arg2[%c0_1, %c0_2] : memref<64x128xbf16, #tpu.memory_space<vmem>>, vector<64x128xbf16>
    %cst = arith.constant dense<0.000000e+00> : vector<8x128xf32>
    %3 = tpu.matmul %1, %2, %cst {dimension_numbers = #tpu.dot_dimension_numbers<[1], [0], [0], [1], [0, 0, 1, 1], [], []>} : vector<8x64xbf16>, vector<64x128xbf16>, vector<8x128xf32> -> vector<8x128xf32>
    %c0_3 = arith.constant 0 : index
    %c0_4 = arith.constant 0 : index
    %4 = vector.load %arg3[%c0_3, %c0_4] : memref<1x128xf32, #tpu.memory_space<vmem>>, vector<1x128xf32>
    %5 = vector.broadcast %4 : vector<1x128xf32> to vector<8x128xf32>
    %6 = arith.addf %3, %5 : vector<8x128xf32>
    %cst_5 = arith.constant 0.000000e+00 : f32
    %7 = vector.broadcast %cst_5 : f32 to vector<8x128xf32>
    %8 = arith.maximumf %6, %7 : vector<8x128xf32>
    %c0_6 = arith.constant 0 : index
    %c0_7 = arith.constant 0 : index
    %9 = vector.load %arg4[%c0_6, %c0_7] : memref<1x128xf32, #tpu.memory_space<vmem>>, vector<1x128xf32>
    %10 = vector.broadcast %9 : vector<1x128xf32> to vector<8x128xf32>
    %11 = arith.mulf %8, %10 : vector<8x128xf32>
    %cst_8 = arith.constant dense<0.000000e+00> : vector<8xf32>
    %12 = vector.multi_reduction <add>, %11, %cst_8 [1] : vector<8x128xf32> to vector<8xf32>
    %13 = vector.shape_cast %12 : vector<8xf32> to vector<8x1xf32>
    %c0_9 = arith.constant 0 : index
    %c0_10 = arith.constant 0 : index
    %14 = vector.load %arg5[%c0_9, %c0_10] : memref<1x1xf32, #tpu.memory_space<vmem>>, vector<1x1xf32>
    %15 = vector.broadcast %14 : vector<1x1xf32> to vector<8x1xf32>
    %16 = arith.addf %13, %15 : vector<8x1xf32>
    %c0_11 = arith.constant 0 : index
    %c0_12 = arith.constant 0 : index
    %17 = vector.load %arg6[%c0_11, %c0_12] : memref<8x1xf32, #tpu.memory_space<vmem>>, vector<8x1xf32>
    tpu.vector_store %arg6[%c0_11, %c0_12], %16 {strides = array<i32>} : memref<8x1xf32, #tpu.memory_space<vmem>>, vector<8x1xf32>,
    return
  }
  func.func @transform_0(%arg0: i32) -> (i32, i32) {
    %c0_i32 = arith.constant 0 : i32
    %c0_i32_0 = arith.constant 0 : i32
    return %arg0, %c0_i32 : i32, i32
  }
  func.func @transform_1(%arg0: i32) -> (i32, i32) {
    %c0_i32 = arith.constant 0 : i32
    %c0_i32_0 = arith.constant 0 : i32
    %c0_i32_1 = arith.constant 0 : i32
    return %c0_i32, %c0_i32_0 : i32, i32
  }
  func.func @transform_2(%arg0: i32) -> (i32, i32) {
    %c0_i32 = arith.constant 0 : i32
    %c0_i32_0 = arith.constant 0 : i32
    %c0_i32_1 = arith.constant 0 : i32
    return %c0_i32, %c0_i32_0 : i32, i32
  }
  func.func @transform_3(%arg0: i32) -> (i32, i32) {
    %c0_i32 = arith.constant 0 : i32
    %c0_i32_0 = arith.constant 0 : i32
    %c0_i32_1 = arith.constant 0 : i32
    return %c0_i32, %c0_i32_0 : i32, i32
  }
  func.func @transform_4(%arg0: i32) -> (i32, i32) {
    %c0_i32 = arith.constant 0 : i32
    %c0_i32_0 = arith.constant 0 : i32
    %c0_i32_1 = arith.constant 0 : i32
    return %c0_i32, %c0_i32_0 : i32, i32
  }
  func.func @transform_5(%arg0: i32) -> (i32, i32) {
    %c0_i32 = arith.constant 0 : i32
    %c0_i32_0 = arith.constant 0 : i32
    return %arg0, %c0_i32 : i32, i32
  }
}

</mosaic_0001>

<bundles_post_ra>
// kernel: tpu_custom_call.1
= control target key start
LH: loop header
LB: loop body
LE: loop exit
PB: predicated region body
PF: predicated region fallthrough
CT: control target
= control target key end

     0   :  { %s261_s0 = inlined_call_operand.hbm [shape: f32[8,64], index: 0, kind: input, shape index: {}]   ;;  %s262_s1 = inlined_call_operand.hbm [shape: bf16[64,128], index: 1, kind: input, shape index: {}]   ;;  %s263_s2 = inlined_call_operand.vmem [shape: f32[1,128], index: 2, kind: input, shape index: {}]   ;;  %s264_s3 = inlined_call_operand.vmem [shape: f32[1,128], index: 3, kind: input, shape index: {}]   ;;  %s265_s4 = inlined_call_operand.<no memory space> [shape: f32[1,1], index: 4, kind: input, shape index: {}]   ;;  %s266_s5 = inlined_call_operand.vmem [shape: f32[8,1], index: 5, kind: output, shape index: {}]  }
   0x1   :  { %v10_v0 = vstv %s265_s4 }
   0x2   :  { %11 = vst [vmem:[#allocation2] sm:$0x1] %v10_v0 }
   0x3   :  { %12 = vsyncpa [#allocation4], 0  ;;  %s19_s22 = sshll.u32 %s261_s0, 4  ;;  %s20_s22 = int_to_ptr.hbm [resolvable:$true] %s19_s22 }
   0x4   :  { %13 = vsyncpa [#allocation6], 0  ;;  %s209_s23 = smov [#allocation3]   ;;  %s29_s27 = sshll.u32 %s262_s1, 4  ;;  %s30_s27 = int_to_ptr.hbm [resolvable:$true] %s29_s27 }
   0x5   :  { %s21_s24 = sshll.u32 %s209_s23, 4  ;;  %s210_s28 = smov [#allocation5]   ;;  %s22_s24 = int_to_ptr.vmem [resolvable:$true] %s21_s24 }
   0x6   :  { %24 = dma.hbm_to_vmem [thread:$0]  %s20_s22, 128, %s22_s24, [#allocation4]  }
   0x7   :  { %s31_s29 = sshll.u32 %s210_s28, 4  ;;  %s211_s4 = smov 64   ;;  %s32_s29 = int_to_ptr.vmem [resolvable:$true] %s31_s29 }
   0x8   :  { %s212_s30 = smov 4  }
   0x9   :  { %37 = dma.hbm_to_vmem [thread:$0]  %s30_s27, 512, %s32_s29, [#allocation6], %s211_s4, %s211_s4, %s212_s30  }
   0xa   :  { %205 = dma.done.wait [#allocation4], 128  }
   0xb   :  { %206 = vsyncadd [#allocation4], 4294967168 }
   0xc   :  { %207 = dma.done.wait [#allocation6], 512  }
   0xd   :  { %208 = vsyncadd [#allocation6], 4294966784  ;;  %v149_v1 = vld [vmem:[#allocation5 + $0x18] sm:$0xff]  ;;  %v148_v2 = vld [vmem:[#allocation5 + $0x10] sm:$0xff]  ;;  %vm91_vm0 = vcmask 523264   ;;  %vm121_vm1 = vcmask 7168  }
   0xe   :  { %99 = vmatpush.bf16.msra.mxu0 %v149_v1  ;;  %v147_v3 = vld [vmem:[#allocation5 + $0x8] sm:$0xff]  ;;  %v146_v4 = vld [vmem:[#allocation5] sm:$0xff]  ;;  %v53_v5 = vld [vmem:[#allocation3] sm:$0xff] }
   0xf   :  { %v54_v6 = vpack.c.bf16 %v53_v5, %v53_v5  ;;  %v154_v7 = vld [vmem:[%s263_s2] ss:$0 sm:$0xff] }
  0x10   :  { %v155_v10 = vld [vmem:[%s264_s3] ss:$0 sm:$0xff] }
  0x11   :  { %v156_v14 = vld [vmem:[#allocation2] ss:$0 sm:$0xff] }
  0x12   :  { %100 = vmatpush.bf16.msra.mxu0 %v148_v2 }
  0x16   :  { %101 = vmatpush.bf16.msra.mxu0 %v147_v3 }
  0x1a   :  { %102 = vmatpush.bf16.msra.mxu0 %v146_v4 }
  0x1d   :  { %145 = vmatmul.msk.bf16.vlgmr.msra.gmra.mxu0 %vm91_vm0, %v54_v6 }
  0x9a   :  { %v104_v8 = vpop.f32.mrf.mxu0 }
  0x9b   :  { %v105_v9 = vadd.f32 %v154_v7, %v104_v8 }
  0x9d   :  { %v108_v11 = vmax.f32 %v105_v9, 0.0 }
  0x9f   :  { %v113_v12 = vmul.f32 %v155_v10, %v108_v11 }
  0xa1   :  { %114 = vadd.xlane.f32.xlu0 %v113_v12 }
  0xa2   :  { %v106_v13 = vpop.f32.mrf.mxu0 }
 0x114   :  { %v115_v15 = vpop.xlane.xlu0 %114 }
 0x115   :  { %v120_v16 = vadd.f32 %v156_v14, %v115_v15 }
 0x117   :  { %122 = vst.msk [vmem:[%s266_s5] sm:$0xff] %vm121_vm1, %v120_v16 }
 0x118   :  { %127 = vsyncpa [#allocation4], 1 }
 0x119   :  { %128 = vsyncpa [#allocation6], 1 }

// kernel: tpu_custom_call.1
= control target key start
LH: loop header
LB: loop body
LE: loop exit
PB: predicated region body
PF: predicated region fallthrough
CT: control target
= control target key end

     0   :  { %s261_s0 = inlined_call_operand.hbm [shape: f32[8,64], index: 0, kind: input, shape index: {}]   ;;  %s262_s1 = inlined_call_operand.hbm [shape: bf16[64,128], index: 1, kind: input, shape index: {}]   ;;  %s263_s2 = inlined_call_operand.vmem [shape: f32[1,128], index: 2, kind: input, shape index: {}]   ;;  %s264_s3 = inlined_call_operand.vmem [shape: f32[1,128], index: 3, kind: input, shape index: {}]   ;;  %s265_s4 = inlined_call_operand.<no memory space> [shape: f32[1,1], index: 4, kind: input, shape index: {}]   ;;  %s266_s5 = inlined_call_operand.vmem [shape: f32[8,1], index: 5, kind: output, shape index: {}]  }
   0x1   :  { %v10_v0 = vstv %s265_s4 }
   0x2   :  { %11 = vst [vmem:[#allocation2] sm:$0x1] %v10_v0 }
   0x3   :  { %12 = vsyncpa [#allocation4], 0  ;;  %s19_s22 = sshll.u32 %s261_s0, 4  ;;  %s20_s22 = int_to_ptr.hbm [resolvable:$true] %s19_s22 }
   0x4   :  { %13 = vsyncpa [#allocation6], 0  ;;  %s209_s23 = smov [#allocation3]   ;;  %s29_s27 = sshll.u32 %s262_s1, 4  ;;  %s30_s27 = int_to_ptr.hbm [resolvable:$true] %s29_s27 }
   0x5   :  { %s21_s24 = sshll.u32 %s209_s23, 4  ;;  %s210_s28 = smov [#allocation5]   ;;  %s22_s24 = int_to_ptr.vmem [resolvable:$true] %s21_s24 }
   0x6   :  { %24 = dma.hbm_to_vmem [thread:$0]  %s20_s22, 128, %s22_s24, [#allocation4]  }
   0x7   :  { %s31_s29 = sshll.u32 %s210_s28, 4  ;;  %s211_s4 = smov 64   ;;  %s32_s29 = int_to_ptr.vmem [resolvable:$true] %s31_s29 }
   0x8   :  { %s212_s30 = smov 4  }
   0x9   :  { %37 = dma.hbm_to_vmem [thread:$0]  %s30_s27, 512, %s32_s29, [#allocation6], %s211_s4, %s211_s4, %s212_s30  }
   0xa   :  { %205 = dma.done.wait [#allocation4], 128  }
   0xb   :  { %206 = vsyncadd [#allocation4], 4294967168 }
   0xc   :  { %207 = dma.done.wait [#allocation6], 512  }
   0xd   :  { %208 = vsyncadd [#allocation6], 4294966784  ;;  %v149_v1 = vld [vmem:[#allocation5 + $0x18] sm:$0xff]  ;;  %v148_v2 = vld [vmem:[#allocation5 + $0x10] sm:$0xff]  ;;  %vm91_vm0 = vcmask 523264   ;;  %vm121_vm1 = vcmask 7168  }
   0xe   :  { %99 = vmatpush.bf16.msra.mxu0 %v149_v1  ;;  %v147_v3 = vld [vmem:[#allocation5 + $0x8] sm:$0xff]  ;;  %v146_v4 = vld [vmem:[#allocation5] sm:$0xff]  ;;  %v53_v5 = vld [vmem:[#allocation3] sm:$0xff] }
   0xf   :  { %v54_v6 = vpack.c.bf16 %v53_v5, %v53_v5  ;;  %v154_v7 = vld [vmem:[%s263_s2] ss:$0 sm:$0xff] }
  0x10   :  { %v155_v10 = vld [vmem:[%s264_s3] ss:$0 sm:$0xff] }
  0x11   :  { %v156_v14 = vld [vmem:[#allocation2] ss:$0 sm:$0xff] }
  0x12   :  { %100 = vmatpush.bf16.msra.mxu0 %v148_v2 }
  0x16   :  { %101 = vmatpush.bf16.msra.mxu0 %v147_v3 }
  0x1a   :  { %102 = vmatpush.bf16.msra.mxu0 %v146_v4 }
  0x1d   :  { %145 = vmatmul.msk.bf16.vlgmr.msra.gmra.mxu0 %vm91_vm0, %v54_v6 }
  0x9a   :  { %v104_v8 = vpop.f32.mrf.mxu0 }
  0x9b   :  { %v105_v9 = vadd.f32 %v154_v7, %v104_v8 }
  0x9d   :  { %v108_v11 = vmax.f32 %v105_v9, 0.0 }
  0x9f   :  { %v113_v12 = vmul.f32 %v155_v10, %v108_v11 }
  0xa1   :  { %114 = vadd.xlane.f32.xlu0 %v113_v12 }
  0xa2   :  { %v106_v13 = vpop.f32.mrf.mxu0 }
 0x114   :  { %v115_v15 = vpop.xlane.xlu0 %114 }
 0x115   :  { %v120_v16 = vadd.f32 %v156_v14, %v115_v15 }
 0x117   :  { %122 = vst.msk [vmem:[%s266_s5] sm:$0xff] %vm121_vm1, %v120_v16 }
 0x118   :  { %127 = vsyncpa [#allocation4], 1 }
 0x119   :  { %128 = vsyncpa [#allocation6], 1 }

</bundles_post_ra>
